<compile_context>
chip_gen: v7x
topology: tpu7x:2x2x1
jax: 0.10.0
libtpu: 0.0.40
codegen_flags: <defaults>
</compile_context>

<pallas_src>
import functools

import jax
import jax.numpy as jnp
from jax.experimental import pallas as pl
from jax.experimental.pallas import tpu as pltpu

LANE = 128  # TPU lane width; the pair axis is padded/tiled in multiples of this.


def relation_mlp_kernel(z_ref, b1_ref, w2t_ref, b2_ref, w3_ref, b3_ref, o_ref):
    """One lane-dense tile of the relation MLP, computed transposed.

    z_ref  : (R, tm)  layer-1 pre-activations A[b,i] + C[b,j] for tm pairs (pairs on lanes)
    b1_ref : (R, 1)   layer-1 bias (broadcast over lanes)
    w2t_ref: (R, R)   W2 transposed, so h2^T = W2^T @ h1^T
    b2_ref : (R, 1)
    w3_ref : (R, 1)   final weight column
    b3_ref : (1, 1)
    o_ref  : (1, tm)  lane-dense relation scores
    """
    h1 = jnp.maximum(z_ref[...] + b1_ref[...], 0.0)                       # VPU
    h2 = jnp.dot(w2t_ref[...], h1, preferred_element_type=jnp.float32)    # MXU (R,R)x(R,tm)
    h2 = jnp.maximum(h2 + b2_ref[...], 0.0)
    # Final R->1 layer as VPU multiply + sublane (XLU) reduce: result is already a
    # lane-dense (1, tm) row -> unmasked full-width store.
    out = jnp.sum(h2 * w3_ref[...], axis=0, keepdims=True) + b3_ref[...]
    o_ref[...] = out.astype(o_ref.dtype)


@functools.partial(jax.jit, static_argnames=("tm",))
def relation_network_forward(features, params, tm=512):
    """features: (B, N, D) -> relations: (B, N*(N-1), 1), PyTorch pair order."""
    w1, b1, w2, b2, w3, b3 = params
    B, N, D = features.shape
    R = w1.shape[1]
    P = N * (N - 1)
    M = B * P

    # Pair index sets in the exact PyTorch nested-loop order (i outer, j inner, i != j).
    idx_i, idx_j = [], []
    for i in range(N):
        for j in range(N):
            if i != j:
                idx_i.append(i)
                idx_j.append(j)
    idx_i = jnp.asarray(idx_i, dtype=jnp.int32)
    idx_j = jnp.asarray(idx_j, dtype=jnp.int32)

    # Factored layer 1: project each point once instead of once per pair.
    feats = features.astype(jnp.float32)
    a = jnp.einsum("bnd,dr->bnr", feats, w1[:D])   # (B, N, R)
    c = jnp.einsum("bnd,dr->bnr", feats, w1[D:])   # (B, N, R)

    # Per-pair layer-1 pre-activation, transposed so the pair index is the lane axis.
    z = (a[:, idx_i, :] + c[:, idx_j, :]).reshape(M, R).T   # (R, M)

    # Tile / pad the pair axis in multiples of 128 lanes.
    tm_eff = max(LANE, min(tm, pl.cdiv(M, LANE) * LANE))
    tm_eff = pl.cdiv(tm_eff, LANE) * LANE
    M_pad = pl.cdiv(M, tm_eff) * tm_eff
    if M_pad != M:
        z = jnp.pad(z, ((0, 0), (0, M_pad - M)))
    num_tiles = M_pad // tm_eff

    b1c = b1.T            # (R, 1)
    w2t = w2.T            # (R, R)
    b2c = b2.T            # (R, 1)

    out_row = pl.pallas_call(
        relation_mlp_kernel,
        out_shape=jax.ShapeDtypeStruct((1, M_pad), jnp.float32),
        grid_spec=pltpu.PrefetchScalarGridSpec(
            num_scalar_prefetch=0,
            grid=(num_tiles,),
            in_specs=[
                pl.BlockSpec((R, tm_eff), lambda m: (0, m)),   # pair pre-activations
                pl.BlockSpec((R, 1), lambda m: (0, 0)),        # b1
                pl.BlockSpec((R, R), lambda m: (0, 0)),        # W2^T
                pl.BlockSpec((R, 1), lambda m: (0, 0)),        # b2
                pl.BlockSpec((R, 1), lambda m: (0, 0)),        # w3
                pl.BlockSpec((1, 1), lambda m: (0, 0)),        # b3
            ],
            out_specs=pl.BlockSpec((1, tm_eff), lambda m: (0, m)),
        ),
        compiler_params=pltpu.CompilerParams(
            dimension_semantics=("parallel",)),
    )(z, b1c, w2t, b2c, w3, b3)

    # Drop padded lanes, restore (B, P, 1) in PyTorch ordering.
    return out_row.reshape(M_pad)[:M].reshape(B, P, 1)


def init_params(key, feature_dim, relation_dim):
    """Deterministic synthetic parameters (weights stored (in, out))."""
    k1, k2, k3, k4, k5, k6 = jax.random.split(key, 6)
    in1 = 2 * feature_dim
    w1 = jax.random.normal(k1, (in1, relation_dim), jnp.float32) / jnp.sqrt(in1)
    b1 = jax.random.normal(k2, (1, relation_dim), jnp.float32) * 0.01
    w2 = jax.random.normal(k3, (relation_dim, relation_dim), jnp.float32) / jnp.sqrt(relation_dim)
    b2 = jax.random.normal(k4, (1, relation_dim), jnp.float32) * 0.01
    w3 = jax.random.normal(k5, (relation_dim, 1), jnp.float32) / jnp.sqrt(relation_dim)
    b3 = jax.random.normal(k6, (1, 1), jnp.float32) * 0.01
    return (w1, b1, w2, b2, w3, b3)


def reference_forward(features, params):
    """Pure-JAX reference mirroring the PyTorch RelationNetwork.forward."""
    w1, b1, w2, b2, w3, b3 = params
    B, N, D = features.shape
    rels = []
    for i in range(N):
        for j in range(N):
            if i != j:
                pair = jnp.concatenate([features[:, i, :], features[:, j, :]], axis=-1)
                h = jnp.maximum(pair @ w1 + b1, 0.0)
                h = jnp.maximum(h @ w2 + b2, 0.0)
                rels.append(h @ w3 + b3)
    return jnp.stack(rels, axis=1)  # (B, N*(N-1), 1)


if __name__ == "__main__":
    B, N, D, R = 2, 8, 32, 32   # batch, num_points, feature_dim, relation_dim

    key = jax.random.PRNGKey(0)
    k_feat, k_par = jax.random.split(key)
    features = jax.random.normal(k_feat, (B, N, D), jnp.float32)
    params = init_params(k_par, D, R)

    out = relation_network_forward(features, params)
    out = jax.block_until_ready(out)

    ref = reference_forward(features, params)
    assert out.shape == (B, N * (N - 1), 1), out.shape
    assert jnp.allclose(out, ref, atol=2e-4, rtol=2e-4), (
        float(jnp.max(jnp.abs(out - ref))))

    print("KERNEL_OK")
</pallas_src>

<mosaic_0001>
module attributes {stable_mosaic.version = 11 : i64} {
  func.func @relation_mlp_kernel(%arg0: i32, %arg1: memref<32x128xf32, #tpu.memory_space<vmem>>, %arg2: memref<32x1xf32, #tpu.memory_space<vmem>>, %arg3: memref<32x32xf32, #tpu.memory_space<vmem>>, %arg4: memref<32x1xf32, #tpu.memory_space<vmem>>, %arg5: memref<32x1xf32, #tpu.memory_space<vmem>>, %arg6: memref<1x1xf32, #tpu.memory_space<vmem>>, %arg7: memref<1x128xf32, #tpu.memory_space<vmem>>) attributes {dimension_semantics = [#tpu.dimension_semantics<parallel>], iteration_bounds = array<i64: 1>, scalar_prefetch = 0 : i64, scratch_operands = 0 : i64, tpu.core_type = #tpu.core_type<tc>, window_params = [{transform_indices = @transform_0, window_bounds = array<i64: 32, 128>}, {pipeline_mode = #tpu.pipeline_mode<synchronous>, transform_indices = @transform_1, window_bounds = array<i64: 32, 1>}, {pipeline_mode = #tpu.pipeline_mode<synchronous>, transform_indices = @transform_2, window_bounds = array<i64: 32, 32>}, {pipeline_mode = #tpu.pipeline_mode<synchronous>, transform_indices = @transform_3, window_bounds = array<i64: 32, 1>}, {pipeline_mode = #tpu.pipeline_mode<synchronous>, transform_indices = @transform_4, window_bounds = array<i64: 32, 1>}, {pipeline_mode = #tpu.pipeline_mode<synchronous>, transform_indices = @transform_5, window_bounds = array<i64: 1, 1>}, {transform_indices = @transform_6, window_bounds = array<i64: 1, 128>}]} {
    %c0 = arith.constant 0 : index
    %c0_0 = arith.constant 0 : index
    %0 = vector.load %arg1[%c0, %c0_0] : memref<32x128xf32, #tpu.memory_space<vmem>>, vector<32x128xf32>
    %c0_1 = arith.constant 0 : index
    %c0_2 = arith.constant 0 : index
    %1 = vector.load %arg2[%c0_1, %c0_2] : memref<32x1xf32, #tpu.memory_space<vmem>>, vector<32x1xf32>
    %2 = vector.broadcast %1 : vector<32x1xf32> to vector<32x128xf32>
    %3 = arith.addf %0, %2 : vector<32x128xf32>
    %cst = arith.constant 0.000000e+00 : f32
    %4 = vector.broadcast %cst : f32 to vector<32x128xf32>
    %5 = arith.maximumf %3, %4 : vector<32x128xf32>
    %c0_3 = arith.constant 0 : index
    %c0_4 = arith.constant 0 : index
    %6 = vector.load %arg3[%c0_3, %c0_4] : memref<32x32xf32, #tpu.memory_space<vmem>>, vector<32x32xf32>
    %cst_5 = arith.constant dense<0.000000e+00> : vector<32x128xf32>
    %7 = tpu.matmul %6, %5, %cst_5 {dimension_numbers = #tpu.dot_dimension_numbers<[1], [0], [0], [1], [0, 0, 1, 1], [], []>} : vector<32x32xf32>, vector<32x128xf32>, vector<32x128xf32> -> vector<32x128xf32>
    %c0_6 = arith.constant 0 : index
    %c0_7 = arith.constant 0 : index
    %8 = vector.load %arg4[%c0_6, %c0_7] : memref<32x1xf32, #tpu.memory_space<vmem>>, vector<32x1xf32>
    %9 = vector.broadcast %8 : vector<32x1xf32> to vector<32x128xf32>
    %10 = arith.addf %7, %9 : vector<32x128xf32>
    %cst_8 = arith.constant 0.000000e+00 : f32
    %11 = vector.broadcast %cst_8 : f32 to vector<32x128xf32>
    %12 = arith.maximumf %10, %11 : vector<32x128xf32>
    %c0_9 = arith.constant 0 : index
    %c0_10 = arith.constant 0 : index
    %13 = vector.load %arg5[%c0_9, %c0_10] : memref<32x1xf32, #tpu.memory_space<vmem>>, vector<32x1xf32>
    %14 = vector.broadcast %13 : vector<32x1xf32> to vector<32x128xf32>
    %15 = arith.mulf %12, %14 : vector<32x128xf32>
    %cst_11 = arith.constant dense<0.000000e+00> : vector<128xf32>
    %16 = vector.multi_reduction <add>, %15, %cst_11 [0] : vector<32x128xf32> to vector<128xf32>
    %17 = vector.shape_cast %16 : vector<128xf32> to vector<1x128xf32>
    %c0_12 = arith.constant 0 : index
    %c0_13 = arith.constant 0 : index
    %18 = vector.load %arg6[%c0_12, %c0_13] : memref<1x1xf32, #tpu.memory_space<vmem>>, vector<1x1xf32>
    %19 = vector.broadcast %18 : vector<1x1xf32> to vector<1x128xf32>
    %20 = arith.addf %17, %19 : vector<1x128xf32>
    %c0_14 = arith.constant 0 : index
    %c0_15 = arith.constant 0 : index
    %21 = vector.load %arg7[%c0_14, %c0_15] : memref<1x128xf32, #tpu.memory_space<vmem>>, vector<1x128xf32>
    tpu.vector_store %arg7[%c0_14, %c0_15], %20 {strides = array<i32>} : memref<1x128xf32, #tpu.memory_space<vmem>>, vector<1x128xf32>,
    return
  }
  func.func @transform_0(%arg0: i32) -> (i32, i32) {
    %c0_i32 = arith.constant 0 : i32
    %c0_i32_0 = arith.constant 0 : i32
    return %c0_i32, %arg0 : i32, i32
  }
  func.func @transform_1(%arg0: i32) -> (i32, i32) {
    %c0_i32 = arith.constant 0 : i32
    %c0_i32_0 = arith.constant 0 : i32
    %c0_i32_1 = arith.constant 0 : i32
    return %c0_i32, %c0_i32_0 : i32, i32
  }
  func.func @transform_2(%arg0: i32) -> (i32, i32) {
    %c0_i32 = arith.constant 0 : i32
    %c0_i32_0 = arith.constant 0 : i32
    %c0_i32_1 = arith.constant 0 : i32
    return %c0_i32, %c0_i32_0 : i32, i32
  }
  func.func @transform_3(%arg0: i32) -> (i32, i32) {
    %c0_i32 = arith.constant 0 : i32
    %c0_i32_0 = arith.constant 0 : i32
    %c0_i32_1 = arith.constant 0 : i32
    return %c0_i32, %c0_i32_0 : i32, i32
  }
  func.func @transform_4(%arg0: i32) -> (i32, i32) {
    %c0_i32 = arith.constant 0 : i32
    %c0_i32_0 = arith.constant 0 : i32
    %c0_i32_1 = arith.constant 0 : i32
    return %c0_i32, %c0_i32_0 : i32, i32
  }
  func.func @transform_5(%arg0: i32) -> (i32, i32) {
    %c0_i32 = arith.constant 0 : i32
    %c0_i32_0 = arith.constant 0 : i32
    %c0_i32_1 = arith.constant 0 : i32
    return %c0_i32, %c0_i32_0 : i32, i32
  }
  func.func @transform_6(%arg0: i32) -> (i32, i32) {
    %c0_i32 = arith.constant 0 : i32
    %c0_i32_0 = arith.constant 0 : i32
    return %c0_i32, %arg0 : i32, i32
  }
}

</mosaic_0001>

<bundles_post_ra>
// kernel: relation_network_forward.1
= control target key start
LH: loop header
LB: loop body
LE: loop exit
PB: predicated region body
PF: predicated region fallthrough
CT: control target
= control target key end

     0   :  { %v285_v0 = vmov 0   ;;  %vm89_vm0 = vcmask 261120   ;;  %v234_v63 = vlaneseq  ;;  %s391_s1 = inlined_call_operand.vmem [shape: f32[32,1], index: 1, kind: input, shape index: {}]   ;;  %s392_s5 = inlined_call_operand.<no memory space> [shape: f32[1,1], index: 5, kind: input, shape index: {}]   ;;  %s393_s3 = inlined_call_operand.vmem [shape: f32[32,1], index: 3, kind: input, shape index: {}]   ;;  %s394_s4 = inlined_call_operand.vmem [shape: f32[32,1], index: 4, kind: input, shape index: {}]   ;;  %s395_s2 = inlined_call_operand.vmem [shape: f32[32,32], index: 2, kind: input, shape index: {}]   ;;  %s396_s0 = inlined_call_operand.vmem [shape: f32[32,128], index: 0, kind: input, shape index: {}]   ;;  %s397_s6 = inlined_call_operand.vmem [shape: f32[1,128], index: 6, kind: output, shape index: {}]  }
   0x1   :  { %284 = vset.pattern.permute.xlu1 %v285_v0  ;;  %283 = vset.pattern.permute.xlu0 %v285_v0  ;;  %v31_v1 = vld [vmem:[%s391_s1 + $0x10] sm:$0xff]  ;;  %v29_v2 = vld [vmem:[%s391_s1] sm:$0xff]  ;;  %v11_v3 = vstv %s392_s5  ;;  %v32_v4 = vld [vmem:[%s391_s1 + $0x18] sm:$0xff] }
   0x2   :  { %45 = vperm.xlu1 %284, %v31_v1   ;;  %35 = vperm.xlu0 %283, %v29_v2   ;;  %12 = vst [vmem:[#allocation2] sm:$0x1] %v11_v3  ;;  %v30_v5 = vld [vmem:[%s391_s1 + $0x8] sm:$0xff]  ;;  %v65_v7 = vld [vmem:[%s393_s3] sm:$0xff]  ;;  %v68_v8 = vld [vmem:[%s393_s3 + $0x18] sm:$0xff]  ;;  %v235_v2 = vshrl.u32 %v234_v63, 7 }
   0x3   :  { %v66_v6 = vld [vmem:[%s393_s3 + $0x8] sm:$0xff]  ;;  %v67_v9 = vld [vmem:[%s393_s3 + $0x10] sm:$0xff]  ;;  %v191_v11 = vld [vmem:[%s394_s4] sm:$0xff] }
   0x4   :  { %v192_v10 = vld [vmem:[%s394_s4 + $0x8] sm:$0xff]  ;;  %v61_v12 = vld [vmem:[%s395_s2] sm:$0xff]  ;;  %v63_v13 = vld [vmem:[%s395_s2 + $0x10] sm:$0xff] }
   0x5   :  { %v194_v14 = vld [vmem:[%s394_s4 + $0x18] sm:$0xff]  ;;  %v193_v15 = vld [vmem:[%s394_s4 + $0x10] sm:$0xff]  ;;  %264 = vmatprep.mubr.msk.f32.mxu0 %vm89_vm0, %v61_v12  ;;  %267 = vmatprep.mubr.msk.f32.mxu1 %vm89_vm0, %v63_v13  ;;  %v25_v20 = vld [vmem:[%s396_s0] sm:$0xff] }
   0x6   :  { %50 = vperm.xlu1 %284, %v32_v4   ;;  %40 = vperm.xlu0 %283, %v30_v5   ;;  %v27_v18 = vld [vmem:[%s396_s0 + $0x10] sm:$0xff]  ;;  %v28_v21 = vld [vmem:[%s396_s0 + $0x18] sm:$0xff]  ;;  %v26_v22 = vld [vmem:[%s396_s0 + $0x8] sm:$0xff]  ;;  %v236_v5 = vsub.s32 0, %v235_v2 }
   0x7   :  { %v62_v35 = vld [vmem:[%s395_s2 + $0x8] sm:$0xff]  ;;  %v64_v36 = vld [vmem:[%s395_s2 + $0x18] sm:$0xff] }
   0x9   :  { %v228_v16 = vld [vmem:[#allocation2] sm:$0x1] }
   0xa   :  { %76 = vperm.xlu1 %284, %v66_v6   ;;  %71 = vperm.xlu0 %283, %v65_v7  }
   0xe   :  { %86 = vperm.xlu1 %284, %v68_v8   ;;  %81 = vperm.xlu0 %283, %v67_v9  }
  0x12   :  { %202 = vperm.xlu1 %284, %v192_v10   ;;  %197 = vperm.xlu0 %283, %v191_v11  }
  0x16   :  { %212 = vperm.xlu1 %284, %v194_v14   ;;  %207 = vperm.xlu0 %283, %v193_v15  }
  0x1a   :  { %231 = vperm.xlu0 %283, %v228_v16  }
  0x81   :  { %v46_v17 = vpop.permute.xlu1 %45  ;;  %v36_v19 = vpop.permute.xlu0 %35 }
  0x82   :  { %v55_v23 = vadd.f32 %v46_v17, %v27_v18  ;;  %v53_v24 = vadd.f32 %v36_v19, %v25_v20 }
  0x84   :  { %v59_v29 = vmax.f32 %v55_v23, 0.0  ;;  %v57_v30 = vmax.f32 %v53_v24, 0.0 }
  0x85   :  { %v51_v25 = vpop.permute.xlu1 %50  ;;  %v41_v26 = vpop.permute.xlu0 %40 }
  0x86   :  { %v56_v27 = vadd.f32 %v51_v25, %v28_v21  ;;  %v54_v28 = vadd.f32 %v41_v26, %v26_v22 }
  0x88   :  { %v60_v31 = vmax.f32 %v56_v27, 0.0  ;;  %v58_v32 = vmax.f32 %v54_v28, 0.0 }
  0x89   :  { %v72_v37 = vpop.permute.xlu0 %71  ;;  %v77_v38 = vpop.permute.xlu1 %76 }
  0x8a   :  { %v270_v33 = vpack.c.bf16 %v58_v32, %v57_v30  ;;  %v274_v34 = vpack.c.bf16 %v60_v31, %v59_v29 }
  0x8c   :  { %271 = vmatprep.subr.bf16.mxu0 %v270_v33  ;;  %278 = vmatprep.subr.bf16.mxu1 %v270_v33 }
  0x8d   :  { %273 = vmatpush3.bf16.msra.mxu0 %v270_v33  ;;  %280 = vmatpush3.bf16.msra.mxu1 %v270_v33  ;;  %v82_v39 = vpop.permute.xlu0 %81  ;;  %v87_v40 = vpop.permute.xlu1 %86 }
  0x8e   :  { %275 = vmatprep.subr.bf16.mxu0 %v274_v34  ;;  %279 = vmatprep.subr.bf16.mxu1 %v274_v34 }
  0x91   :  { %277 = vmatpush3.bf16.msra.mxu0 %v274_v34  ;;  %281 = vmatpush3.bf16.msra.mxu1 %v274_v34  ;;  %v198_v41 = vpop.permute.xlu0 %197  ;;  %v203_v50 = vpop.permute.xlu1 %202 }
  0x94   :  { %265 = vmatmul.mubr.msk.f32.vlgmr.msra.gmra.mrb[0].mxu0 %vm89_vm0, %v62_v35  ;;  %268 = vmatmul.mubr.msk.f32.vlgmr.msra.gmra.mrb[0].mxu1 %vm89_vm0, %v64_v36 }
  0x95   :  { %v208_v57 = vpop.permute.xlu0 %207  ;;  %v213_v60 = vpop.permute.xlu1 %212 }
  0x99   :  { %v232_v7 = vpop.permute.xlu0 %231 }
  0x9a   :  { %v237_v9 = vrot.slane %v232_v7, %v236_v5 }
 0x167   :  { %v266_v42 = vpop.f32.mrb[0].mxu0  ;;  %v269_v43 = vpop.f32.mrb[0].mxu1 }
 0x168   :  { %v174_v44 = vadd.f32 %v266_v42, %v77_v38  ;;  %v168_v45 = vpop.f32.mrb[1].mxu0  ;;  %v178_v46 = vpop.f32.mrb[1].mxu1  ;;  %v184_v47 = vadd.f32 %v269_v43, %v87_v40 }
 0x169   :  { %v169_v48 = vadd.f32 %v168_v45, %v72_v37  ;;  %v179_v49 = vadd.f32 %v178_v46, %v82_v39 }
 0x16a   :  { %v188_v51 = vmax.f32 %v174_v44, 0.0  ;;  %v190_v55 = vmax.f32 %v184_v47, 0.0 }
 0x16b   :  { %v187_v52 = vmax.f32 %v169_v48, 0.0  ;;  %v189_v53 = vmax.f32 %v179_v49, 0.0 }
 0x16c   :  { %v216_v54 = vmul.f32 %v203_v50, %v188_v51  ;;  %v218_v61 = vmul.f32 %v213_v60, %v190_v55 }
 0x16d   :  { %v215_v56 = vmul.f32 %v198_v41, %v187_v52  ;;  %v217_v59 = vmul.f32 %v208_v57, %v189_v53 }
 0x16f   :  { %v219_v58 = vadd.f32 %v216_v54, %v215_v56 }
 0x171   :  { %v220_v62 = vadd.f32 %v219_v58, %v217_v59 }
 0x173   :  { %v221_v0 = vadd.f32 %v220_v62, %v218_v61 }
 0x175   :  { %v222_v1 = vrot.slane %v221_v0, 4 }
 0x177   :  { %v223_v3 = vadd.f32 %v222_v1, %v221_v0 }
 0x179   :  { %v224_v4 = vrot.slane %v223_v3, 2 }
 0x17b   :  { %v225_v6 = vadd.f32 %v224_v4, %v223_v3 }
 0x17d   :  { %v226_v8 = vrot.slane %v225_v6, 1 }
 0x17f   :  { %v227_v10 = vadd.f32 %v226_v8, %v225_v6 }
 0x181   :  { %v238_v11 = vadd.f32 %v237_v9, %v227_v10 }
 0x183   :  { %239 = vst [vmem:[%s397_s6] sm:$0x1] %v238_v11 }

</bundles_post_ra>
